<compile_context>
chip_gen: v7x
topology: tpu7x:2x2x1
jax: 0.10.0
libtpu: 0.0.40
codegen_flags: <defaults>
</compile_context>

<pallas_src>
import math

import jax
import jax.numpy as jnp
from jax.experimental import pallas as pl
from jax.experimental.pallas import tpu as pltpu


def _round_up(x, m):
    return (x + m - 1) // m * m


def _projection_kernel(x_ref, w_ref, b_ref, o_ref, acc_ref):
    # x_ref: (tm, tk)  w_ref: (tk, tn)  b_ref: (1, tn)  o_ref: (tm, tn)
    # acc_ref: (tm, tn) f32 scratch, persists across the K grid axis.
    k = pl.program_id(2)

    @pl.when(k == 0)
    def _init():
        acc_ref[...] = jnp.zeros_like(acc_ref)

    acc_ref[...] += jnp.dot(
        x_ref[...], w_ref[...], preferred_element_type=jnp.float32
    )

    @pl.when(k == pl.num_programs(2) - 1)
    def _finalize():
        acc = acc_ref[...] + b_ref[...].astype(jnp.float32)
        o_ref[...] = acc.astype(o_ref.dtype)


def _pick_tiles(m, k, n, itemsize):
    """Choose (tm, tn, tk) that fit the per-generation VMEM budget."""
    try:
        vmem_cap = pltpu.get_tpu_info().vmem_capacity_bytes
    except Exception:
        vmem_cap = 64 * 1024 * 1024  # conservative (v7x per-TC VMEM)
    budget = int(vmem_cap * 0.55)

    # Prefer tk = full d_model (weight streamed once per M-tile sweep, no
    # K grid axis needed for typical d_model); otherwise tile K by 2048.
    tk = k if k <= 4096 else 2048
    tm = min(512, _round_up(m, 8))        # large M tile -> fewer weight re-reads
    tn = min(1024, _round_up(n, 128))     # lane-dense output stores

    def footprint(tm_, tn_, tk_):
        # Double-buffered x/w/b/out tiles + f32 accumulator.
        return (2 * (tm_ * tk_ + tk_ * tn_ + tm_ * tn_ + tn_) * itemsize
                + tm_ * tn_ * 4)

    while footprint(tm, tn, tk) > budget:
        if tn > 512:
            tn //= 2
        elif tm > 64:
            tm = max(8, (tm // 2) // 8 * 8)
        elif tk >= 1024 and (tk // 2) % 128 == 0:
            tk //= 2
        elif tn > 128:
            tn //= 2
        elif tm > 8:
            tm = max(8, (tm // 2) // 8 * 8)
        else:
            break
    return tm, tn, tk


def projection_layer(x, w_t, b, *, tm=None, tn=None, tk=None):
    """Equivalent of nn.Linear(d_model, vocab) applied to x.

    x:   (batch, seq, d_model)
    w_t: (d_model, vocab)   -- transposed PyTorch weight
    b:   (vocab,)
    Returns (batch, seq, vocab).
    """
    batch, seq, d_model = x.shape
    vocab = w_t.shape[1]
    m = batch * seq
    itemsize = jnp.dtype(x.dtype).itemsize

    atm, atn, atk = _pick_tiles(m, d_model, vocab, itemsize)
    tm = tm or atm
    tn = tn or atn
    tk = tk or atk

    m_pad = _round_up(m, tm)
    k_pad = _round_up(d_model, tk)
    n_pad = _round_up(vocab, tn)

    x2d = x.reshape(m, d_model)
    if (m_pad, k_pad) != (m, d_model):
        x2d = jnp.pad(x2d, ((0, m_pad - m), (0, k_pad - d_model)))
    w2d = w_t
    if (k_pad, n_pad) != (d_model, vocab):
        w2d = jnp.pad(w_t, ((0, k_pad - d_model), (0, n_pad - vocab)))
    b2d = b.reshape(1, vocab)
    if n_pad != vocab:
        b2d = jnp.pad(b2d, ((0, 0), (0, n_pad - vocab)))

    grid = (m_pad // tm, n_pad // tn, k_pad // tk)

    tiles_bytes = (2 * (tm * tk + tk * tn + tm * tn + tn) * itemsize
                   + tm * tn * 4)
    vmem_limit = int(min(112 * 1024 * 1024,
                         max(2 * tiles_bytes, 32 * 1024 * 1024)))

    cost = pl.CostEstimate(
        flops=2 * m * d_model * vocab,
        transcendentals=0,
        bytes_accessed=(m * d_model + d_model * vocab + m * vocab + vocab)
        * itemsize,
    )

    out2d = pl.pallas_call(
        _projection_kernel,
        out_shape=jax.ShapeDtypeStruct((m_pad, n_pad), x.dtype),
        grid_spec=pltpu.PrefetchScalarGridSpec(
            num_scalar_prefetch=0,
            grid=grid,
            in_specs=[
                pl.BlockSpec((tm, tk), lambda i, j, k: (i, k)),
                pl.BlockSpec((tk, tn), lambda i, j, k: (k, j)),
                pl.BlockSpec((1, tn), lambda i, j, k: (0, j)),
            ],
            out_specs=pl.BlockSpec((tm, tn), lambda i, j, k: (i, j)),
            scratch_shapes=[pltpu.VMEM((tm, tn), jnp.float32)],
        ),
        compiler_params=pltpu.CompilerParams(
            dimension_semantics=("parallel", "parallel", "arbitrary"),
            vmem_limit_bytes=vmem_limit,
        ),
        cost_estimate=cost,
    )(x2d, w2d, b2d)

    return out2d[:m, :vocab].reshape(batch, seq, vocab)


if __name__ == "__main__":
    key = jax.random.PRNGKey(0)

    # --- Test 1: small shapes implied by the module (single-tile grid).
    batch, seq, d_model, vocab_size = 2, 8, 32, 128
    kx, kw, kb, key = jax.random.split(key, 4)
    bound = 1.0 / math.sqrt(d_model)
    w = jax.random.uniform(kw, (vocab_size, d_model), jnp.float32,
                           minval=-bound, maxval=bound)  # PyTorch (out, in)
    b = jax.random.uniform(kb, (vocab_size,), jnp.float32,
                           minval=-bound, maxval=bound)
    x = jax.random.normal(kx, (batch, seq, d_model), jnp.float32)

    out = jax.block_until_ready(projection_layer(x, w.T, b))
    ref = x @ w.T + b
    assert out.shape == (batch, seq, vocab_size)
    assert jnp.allclose(out, ref, atol=1e-4, rtol=1e-4)

    # --- Test 2: force a multi-tile M/N/K grid (exercises K accumulation,
    #             bias gated to the final K step, and edge padding).
    batch, seq, d_model, vocab_size = 2, 72, 256, 640
    kx, kw, kb, key = jax.random.split(key, 4)
    bound = 1.0 / math.sqrt(d_model)
    w = jax.random.uniform(kw, (vocab_size, d_model), jnp.float32,
                           minval=-bound, maxval=bound)
    b = jax.random.uniform(kb, (vocab_size,), jnp.float32,
                           minval=-bound, maxval=bound)
    x = jax.random.normal(kx, (batch, seq, d_model), jnp.float32)

    out = jax.block_until_ready(
        projection_layer(x, w.T, b, tm=64, tn=256, tk=128))
    ref = x @ w.T + b
    assert out.shape == (batch, seq, vocab_size)
    assert jnp.allclose(out, ref, atol=1e-3, rtol=1e-3)

    print("KERNEL_OK")
</pallas_src>

<mosaic_0001>
module attributes {stable_mosaic.version = 11 : i64} {
  func.func @_projection_kernel(%arg0: i32, %arg1: i32, %arg2: i32, %arg3: memref<16x32xf32, #tpu.memory_space<vmem>>, %arg4: memref<32x128xf32, #tpu.memory_space<vmem>>, %arg5: memref<1x128xf32, #tpu.memory_space<vmem>>, %arg6: memref<16x128xf32, #tpu.memory_space<vmem>>, %arg7: memref<16x128xf32, #tpu.memory_space<vmem>>) attributes {dimension_semantics = [#tpu.dimension_semantics<parallel>, #tpu.dimension_semantics<parallel>, #tpu.dimension_semantics<arbitrary>], iteration_bounds = array<i64: 1, 1, 1>, scalar_prefetch = 0 : i64, scratch_operands = 1 : i64, tpu.core_type = #tpu.core_type<tc>, window_params = [{transform_indices = @transform_0, window_bounds = array<i64: 16, 32>}, {transform_indices = @transform_1, window_bounds = array<i64: 32, 128>}, {transform_indices = @transform_2, window_bounds = array<i64: 1, 128>}, {transform_indices = @transform_3, window_bounds = array<i64: 16, 128>}]} {
    %c0_i32 = arith.constant 0 : i32
    %0 = arith.cmpi eq, %arg2, %c0_i32 : i32
    %1 = arith.extui %0 : i1 to i32
    %c0_i32_0 = arith.constant 0 : i32
    %2 = arith.cmpi ne, %1, %c0_i32_0 : i32
    scf.if %2 {
      %cst_10 = arith.constant 0.000000e+00 : f32
      %12 = vector.broadcast %cst_10 : f32 to vector<16x128xf32>
      %c0_11 = arith.constant 0 : index
      %c0_12 = arith.constant 0 : index
      %13 = vector.load %arg7[%c0_11, %c0_12] : memref<16x128xf32, #tpu.memory_space<vmem>>, vector<16x128xf32>
      tpu.vector_store %arg7[%c0_11, %c0_12], %12 {strides = array<i32>} : memref<16x128xf32, #tpu.memory_space<vmem>>, vector<16x128xf32>,
    } else {
    }
    %c0 = arith.constant 0 : index
    %c0_1 = arith.constant 0 : index
    %3 = vector.load %arg7[%c0, %c0_1] : memref<16x128xf32, #tpu.memory_space<vmem>>, vector<16x128xf32>
    %c0_2 = arith.constant 0 : index
    %c0_3 = arith.constant 0 : index
    %4 = vector.load %arg3[%c0_2, %c0_3] : memref<16x32xf32, #tpu.memory_space<vmem>>, vector<16x32xf32>
    %c0_4 = arith.constant 0 : index
    %c0_5 = arith.constant 0 : index
    %5 = vector.load %arg4[%c0_4, %c0_5] : memref<32x128xf32, #tpu.memory_space<vmem>>, vector<32x128xf32>
    %cst = arith.constant dense<0.000000e+00> : vector<16x128xf32>
    %6 = tpu.matmul %4, %5, %cst {dimension_numbers = #tpu.dot_dimension_numbers<[1], [0], [0], [1], [0, 0, 1, 1], [], []>} : vector<16x32xf32>, vector<32x128xf32>, vector<16x128xf32> -> vector<16x128xf32>
    %7 = arith.addf %3, %6 : vector<16x128xf32>
    %c0_6 = arith.constant 0 : index
    %c0_7 = arith.constant 0 : index
    %8 = vector.load %arg7[%c0_6, %c0_7] : memref<16x128xf32, #tpu.memory_space<vmem>>, vector<16x128xf32>
    tpu.vector_store %arg7[%c0_6, %c0_7], %7 {strides = array<i32>} : memref<16x128xf32, #tpu.memory_space<vmem>>, vector<16x128xf32>,
    %c0_i32_8 = arith.constant 0 : i32
    %9 = arith.cmpi eq, %arg2, %c0_i32_8 : i32
    %10 = arith.extui %9 : i1 to i32
    %c0_i32_9 = arith.constant 0 : i32
    %11 = arith.cmpi ne, %10, %c0_i32_9 : i32
    scf.if %11 {
      %c0_10 = arith.constant 0 : index
      %c0_11 = arith.constant 0 : index
      %12 = vector.load %arg7[%c0_10, %c0_11] : memref<16x128xf32, #tpu.memory_space<vmem>>, vector<16x128xf32>
      %c0_12 = arith.constant 0 : index
      %c0_13 = arith.constant 0 : index
      %13 = vector.load %arg5[%c0_12, %c0_13] : memref<1x128xf32, #tpu.memory_space<vmem>>, vector<1x128xf32>
      %14 = vector.broadcast %13 : vector<1x128xf32> to vector<16x128xf32>
      %15 = arith.addf %12, %14 : vector<16x128xf32>
      %c0_14 = arith.constant 0 : index
      %c0_15 = arith.constant 0 : index
      %16 = vector.load %arg6[%c0_14, %c0_15] : memref<16x128xf32, #tpu.memory_space<vmem>>, vector<16x128xf32>
      tpu.vector_store %arg6[%c0_14, %c0_15], %15 {strides = array<i32>} : memref<16x128xf32, #tpu.memory_space<vmem>>, vector<16x128xf32>,
    } else {
    }
    return
  }
  func.func @transform_0(%arg0: i32, %arg1: i32, %arg2: i32) -> (i32, i32) {
    %c0_i32 = arith.constant 0 : i32
    return %arg0, %arg2 : i32, i32
  }
  func.func @transform_1(%arg0: i32, %arg1: i32, %arg2: i32) -> (i32, i32) {
    %c0_i32 = arith.constant 0 : i32
    return %arg2, %arg1 : i32, i32
  }
  func.func @transform_2(%arg0: i32, %arg1: i32, %arg2: i32) -> (i32, i32) {
    %c0_i32 = arith.constant 0 : i32
    %c0_i32_0 = arith.constant 0 : i32
    return %c0_i32, %arg1 : i32, i32
  }
  func.func @transform_3(%arg0: i32, %arg1: i32, %arg2: i32) -> (i32, i32) {
    %c0_i32 = arith.constant 0 : i32
    return %arg0, %arg1 : i32, i32
  }
}

</mosaic_0001>

<bundles_post_ra>
// kernel: tpu_custom_call.1
= control target key start
LH: loop header
LB: loop body
LE: loop exit
PB: predicated region body
PF: predicated region fallthrough
CT: control target
= control target key end

     0   :  { %8 = vsyncpa [#allocation4], 0  ;;  %s355_s0 = inlined_call_operand.hbm [shape: f32[16,32], index: 0, kind: input, shape index: {}]   ;;  %s356_s1 = inlined_call_operand.hbm [shape: f32[32,128], index: 1, kind: input, shape index: {}]   ;;  %s357_s2 = inlined_call_operand.vmem [shape: f32[1,128], index: 2, kind: input, shape index: {}]   ;;  %s358_s3 = inlined_call_operand.hbm [shape: f32[16,128], index: 3, kind: output, shape index: {}]  }
   0x1   :  { %9 = vsyncpa [#allocation7], 0 }
   0x2   :  { %10 = vsyncpa [#allocation5], 0  ;;  %s282_s12 = smov [#allocation3]   ;;  %s210_s16 = scalar_lea.hbm %s355_s0, 256 }
   0x3   :  { %s16_s13 = sshll.u32 %s282_s12, 4  ;;  %p211_p0 = scmp.ne.s32.totalorder %s355_s0, %s210_s16  ;;  %s17_s13 = int_to_ptr.vmem [resolvable:$true] %s16_s13 }
   0x4   :  { %p214_p1 = scmp.lt.u32.totalorder %s210_s16, %s355_s0 }
   0x6   :  { %p216_p2 = pnand %p214_p1, %p211_p0 }
   0x8   :  { %219 = shalt.err (!%p216_p2)
}
   0x9   :  { %s220_s21 = scalar_lea.vmem %s17_s13, 256  ;;  %p225_p4 = scmp.lt.s32.totalorder %s17_s13, %s17_s13 }
   0xa   :  { %p221_p3 = scmp.ne.s32.totalorder %s17_s13, %s220_s21  ;;  %p226_p5 = scmp.lt.s32.totalorder %s220_s21, %s220_s21 }
   0xc   :  { %p227_p6 = por %p226_p5, %p225_p4 }
   0xe   :  { %p228_p7 = pnand %p227_p6, %p221_p3 }
  0x10   :  { %231 = shalt.err (!%p228_p7)
}
  0x11   :  { %s283_s22 = smov 128   ;;  %s284_s23 = smov 8  }
  0x12   :  { %22 = dma.hbm_to_vmem [thread:$0]  %s355_s0, 256, %s17_s13, [#allocation4], %s283_s22, %s283_s22, %s284_s23  }
  0x13   :  { %s285_s26 = smov [#allocation6]   ;;  %s232_s30 = scalar_lea.hbm %s356_s1, 512 }
  0x14   :  { %s28_s27 = sshll.u32 %s285_s26, 4  ;;  %p233_p8 = scmp.ne.s32.totalorder %s356_s1, %s232_s30  ;;  %s29_s27 = int_to_ptr.vmem [resolvable:$true] %s28_s27 }
  0x15   :  { %p236_p9 = scmp.lt.u32.totalorder %s232_s30, %s356_s1 }
  0x17   :  { %p238_p10 = pnand %p236_p9, %p233_p8 }
  0x19   :  { %241 = shalt.err (!%p238_p10)
}
  0x1a   :  { %s242_s8 = scalar_lea.vmem %s29_s27, 512  ;;  %p247_p12 = scmp.lt.s32.totalorder %s29_s27, %s29_s27 }
  0x1b   :  { %p243_p11 = scmp.ne.s32.totalorder %s29_s27, %s242_s8  ;;  %p248_p13 = scmp.lt.s32.totalorder %s242_s8, %s242_s8 }
  0x1d   :  { %p249_p0 = por %p248_p13, %p247_p12 }
  0x1f   :  { %p250_p1 = pnand %p249_p0, %p243_p11 }
  0x21   :  { %253 = shalt.err (!%p250_p1)
}
  0x22   :  { %34 = dma.hbm_to_vmem [thread:$0]  %s356_s1, 512, %s29_s27, [#allocation7], %s283_s22, %s283_s22, %s284_s23  }
  0x23   :  { %276 = dma.done.wait [#allocation4], 256  }
  0x24   :  { %277 = vsyncadd [#allocation4], 4294967040 }
  0x25   :  { %278 = dma.done.wait [#allocation7], 512  }
  0x26   :  { %279 = vsyncadd [#allocation7], 4294966784  ;;  %vm57_vm0 = vcmask 261120   ;;  %v53_v0 = vld [vmem:[#allocation6] sm:$0xff]  ;;  %v54_v1 = vld [vmem:[#allocation6 + $0x8] sm:$0xff]  ;;  %s286_s11 = smov [#allocation8]  }
  0x27   :  { %v55_v2 = vld [vmem:[#allocation6 + $0x10] sm:$0xff]  ;;  %v197_v3 = vpack.c.bf16 %v54_v1, %v53_v0  ;;  %v56_v4 = vld [vmem:[#allocation6 + $0x18] sm:$0xff]  ;;  %s164_s12 = sshll.u32 %s286_s11, 4  ;;  %s165_s12 = int_to_ptr.vmem [resolvable:$true] %s164_s12 }
  0x28   :  { %v51_v5 = vld [vmem:[#allocation3] sm:$0xff]  ;;  %v201_v6 = vpack.c.bf16 %v56_v4, %v55_v2  ;;  %v52_v7 = vld [vmem:[#allocation3 + $0x8] sm:$0xff]  ;;  %s254_s13 = scalar_lea.vmem %s165_s12, 256  ;;  %p259_p3 = scmp.lt.s32.totalorder %s165_s12, %s165_s12 }
  0x29   :  { %194 = vmatprep.mubr.msk.f32.mxu0 %vm57_vm0, %v51_v5  ;;  %198 = vmatprep.subr.bf16.mxu0 %v197_v3  ;;  %v179_v8 = vld [vmem:[%s357_s2] ss:$0 sm:$0xff]  ;;  %p255_p2 = scmp.ne.s32.totalorder %s165_s12, %s254_s13  ;;  %p260_p4 = scmp.lt.s32.totalorder %s254_s13, %s254_s13 }
  0x2a   :  { %200 = vmatpush3.bf16.msra.mxu0 %v197_v3 }
  0x2b   :  { %202 = vmatprep.subr.bf16.mxu0 %v201_v6  ;;  %p261_p5 = por %p260_p4, %p259_p3 }
  0x2d   :  { %p262_p6 = pnand %p261_p5, %p255_p2 }
  0x2e   :  { %204 = vmatpush3.bf16.msra.mxu0 %v201_v6 }
  0x31   :  { %195 = vmatmul.mubr.msk.f32.vlgmr.msra.gmra.mrb[0].mxu0 %vm57_vm0, %v52_v7 }
 0x104   :  { %v196_v9 = vpop.f32.mrb[0].mxu0 }
 0x105   :  { %v156_v10 = vadd.f32 %v196_v9, %v179_v8  ;;  %v130_v11 = vpop.f32.mrb[1].mxu0 }
 0x106   :  { %v155_v12 = vadd.f32 %v179_v8, %v130_v11 }
 0x107   :  { %158 = vst [vmem:[#allocation8 + $0x8] sm:$0xff] %v156_v10 }
 0x108   :  { %157 = vst [vmem:[#allocation8] sm:$0xff] %v155_v12 }
 0x109   :  { %265 = shalt.err (!%p262_p6)
}
 0x10a   :  { %s266_s2 = scalar_lea.hbm %s358_s3, 256 }
 0x10b   :  { %p267_p7 = scmp.ne.s32.totalorder %s358_s3, %s266_s2  ;;  %p270_p8 = scmp.lt.u32.totalorder %s266_s2, %s358_s3 }
 0x10d   :  { %p272_p9 = pnand %p270_p8, %p267_p7 }
 0x10f   :  { %275 = shalt.err (!%p272_p9)
}
 0x110   :  { %170 = dma.vmem_to_hbm [thread:$0]  %s165_s12, 256, %s358_s3, [#allocation5], %s283_s22, %s283_s22, %s284_s23  }
 0x111   :  { %280 = dma.done.wait [#allocation5], 256  }
 0x112   :  { %281 = vsyncadd [#allocation5], 4294967040 }
 0x113   :  { %174 = vsyncpa [#allocation4], 1 }
 0x114   :  { %175 = vsyncpa [#allocation7], 1 }
 0x115   :  { %176 = vsyncpa [#allocation5], 1 }

</bundles_post_ra>
